<compile_context>
chip_gen: v7x
topology: tpu7x:2x2x1
jax: 0.10.0
libtpu: 0.0.40
codegen_flags: <defaults>
</compile_context>

<pallas_src>
import math

import jax
import jax.numpy as jnp
from jax.experimental import pallas as pl
from jax.experimental.pallas import tpu as pltpu


def _round_up(x, m):
    return (x + m - 1) // m * m


def _cdiv(a, b):
    return (a + b - 1) // b


# ----------------------------------------------------------------------------
# Fused kernel: conv-3 (replicate pad, BN folded) -> ReLU -> conv-1 (pointwise)
# ----------------------------------------------------------------------------
def _out_double_conv_kernel(x_ref, halo_ref, w1k0_ref, w1k1_ref, w1k2_ref,
                            b1_ref, w2_ref, b2_ref, o_ref):
    """One (sequence n, time-tile j) block.

    x_ref    : (Cin,  tile_t)   padded input, positions [j*tile_t, j*tile_t+tile_t)
    halo_ref : (Cin,  128)      next 128 padded positions (right halo)
    w1k*_ref : (Cmid, Cin)      conv-3 tap weights (BN scale folded in)
    b1_ref   : (Cmid, 1) f32    conv-3 bias + BN shift folded in
    w2_ref   : (Cout, Cmid)     pointwise conv weight
    b2_ref   : (Cout, 1) f32    pointwise conv bias
    o_ref    : (Cout, tile_t)
    """
    tile_t = o_ref.shape[-1]
    x = x_ref[...]
    # (Cin, tile_t + 128); both pieces are lane-aligned multiples of 128.
    win = jnp.concatenate([x, halo_ref[...]], axis=-1)
    x1 = win[:, 1:tile_t + 1]          # tap centered at t   (padded coords)
    x2 = win[:, 2:tile_t + 2]          # tap at t + 1        (padded coords)

    # Conv k=3 as three small matmuls, f32 accumulation; mid act never leaves
    # the chip.
    h = jnp.dot(w1k0_ref[...], x, preferred_element_type=jnp.float32)
    h = h + jnp.dot(w1k1_ref[...], x1, preferred_element_type=jnp.float32)
    h = h + jnp.dot(w1k2_ref[...], x2, preferred_element_type=jnp.float32)
    h = h + b1_ref[...]
    h = jnp.maximum(h, 0.0)            # BN folded into weights; f32 epilogue

    y = jnp.dot(w2_ref[...], h.astype(w2_ref.dtype),
                preferred_element_type=jnp.float32) + b2_ref[...]
    o_ref[...] = y.astype(o_ref.dtype)


# ----------------------------------------------------------------------------
# pallas_call wrapper (input/output in PyTorch NCT layout, no transposes)
# ----------------------------------------------------------------------------
def out_double_conv_forward(params, x_nct, *, tile_t_max=4096, matmul_dtype=None):
    """x_nct: (N, C_in, T) -> (N, C_out, T), matching OutDoubleConv.forward (eval)."""
    w1, b1 = params["w1"], params["b1"]          # (Cmid, Cin, 3), (Cmid,)
    gamma, beta = params["gamma"], params["beta"]
    mean, var, eps = params["mean"], params["var"], params["eps"]
    w2, b2 = params["w2"], params["b2"]          # (Cout, Cmid, 1), (Cout,)

    N, Cin, T = x_nct.shape
    Cmid = w1.shape[0]
    Cout = w2.shape[0]
    out_dtype = x_nct.dtype
    # Set matmul_dtype=jnp.bfloat16 on v6e/v7x to halve MXU-operand HBM bytes;
    # biases / accumulation / epilogue stay f32 either way.
    op_dtype = out_dtype if matmul_dtype is None else matmul_dtype

    # ---- fold inference-mode BatchNorm into conv-3 weight/bias (f32 math) ---
    f32 = jnp.float32
    scale = gamma.astype(f32) / jnp.sqrt(var.astype(f32) + eps)          # (Cmid,)
    w1_f = w1.astype(f32) * scale[:, None, None]                         # (Cmid,Cin,3)
    w1_k0 = w1_f[:, :, 0].astype(op_dtype)
    w1_k1 = w1_f[:, :, 1].astype(op_dtype)
    w1_k2 = w1_f[:, :, 2].astype(op_dtype)
    b1_eff = (beta.astype(f32)
              + scale * (b1.astype(f32) - mean.astype(f32))).reshape(Cmid, 1)
    w2_mat = w2[:, :, 0].astype(op_dtype)                                # (Cout,Cmid)
    b2_eff = b2.astype(f32).reshape(Cout, 1)

    # ---- time tiling: lane-dense tiles, large to amortize per-step overhead,
    #      but keep >= 4 total grid steps so both v7x TensorCores stay busy ----
    tile_t = min(_round_up(tile_t_max, 128), _round_up(T, 128))
    while tile_t > 128 and N * _cdiv(T, tile_t) < 4:
        tile_t = _round_up(max(128, tile_t // 2), 128)
    n_t = _cdiv(T, tile_t)
    t_out_pad = n_t * tile_t
    t_in_pad = t_out_pad + 128                     # room for the right-halo block

    # Replicate padding per sequence: 1 frame on the left (conv halo), the rest
    # on the right (tile + halo rounding); padded-tail outputs are sliced off.
    x_pad = jnp.pad(x_nct, ((0, 0), (0, 0), (1, t_in_pad - T - 1)), mode="edge")
    x_pad = x_pad.astype(op_dtype)

    tpb = tile_t // 128                            # halo offset in 128-wide blocks

    bytes_in = int(x_pad.size) * jnp.dtype(op_dtype).itemsize
    bytes_out = N * Cout * t_out_pad * jnp.dtype(out_dtype).itemsize

    out = pl.pallas_call(
        _out_double_conv_kernel,
        out_shape=jax.ShapeDtypeStruct((N, Cout, t_out_pad), out_dtype),
        grid_spec=pltpu.PrefetchScalarGridSpec(
            num_scalar_prefetch=0,
            grid=(N, n_t),
            in_specs=[
                pl.BlockSpec((None, Cin, tile_t), lambda n, j: (n, 0, j)),
                pl.BlockSpec((None, Cin, 128), lambda n, j: (n, 0, (j + 1) * tpb)),
                pl.BlockSpec((Cmid, Cin), lambda n, j: (0, 0)),
                pl.BlockSpec((Cmid, Cin), lambda n, j: (0, 0)),
                pl.BlockSpec((Cmid, Cin), lambda n, j: (0, 0)),
                pl.BlockSpec((Cmid, 1), lambda n, j: (0, 0)),
                pl.BlockSpec((Cout, Cmid), lambda n, j: (0, 0)),
                pl.BlockSpec((Cout, 1), lambda n, j: (0, 0)),
            ],
            out_specs=pl.BlockSpec((None, Cout, tile_t), lambda n, j: (n, 0, j)),
        ),
        compiler_params=pltpu.CompilerParams(
            dimension_semantics=("parallel", "parallel")),
        cost_estimate=pl.CostEstimate(
            flops=2 * N * t_out_pad * (3 * Cin * Cmid + Cmid * Cout),
            transcendentals=0,
            bytes_accessed=bytes_in + bytes_out),
    )(x_pad, x_pad, w1_k0, w1_k1, w1_k2, b1_eff, w2_mat, b2_eff)

    return out[:, :, :T]


# ----------------------------------------------------------------------------
# Parameter init (PyTorch Conv1d default: U(-sqrt(k), sqrt(k)), k = 1/(Cin*K))
# ----------------------------------------------------------------------------
def init_out_double_conv_params(key, in_channels, out_channels,
                                mid_channels=None, dtype=jnp.float32):
    if not mid_channels:
        mid_channels = out_channels // 2
    k = jax.random.split(key, 8)
    bnd1 = 1.0 / math.sqrt(in_channels * 3)
    bnd2 = 1.0 / math.sqrt(mid_channels * 1)
    return {
        "w1": jax.random.uniform(k[0], (mid_channels, in_channels, 3), dtype,
                                 minval=-bnd1, maxval=bnd1),
        "b1": jax.random.uniform(k[1], (mid_channels,), dtype,
                                 minval=-bnd1, maxval=bnd1),
        "gamma": jax.random.uniform(k[2], (mid_channels,), dtype, 0.5, 1.5),
        "beta": jax.random.uniform(k[3], (mid_channels,), dtype, -0.5, 0.5),
        "mean": jax.random.uniform(k[4], (mid_channels,), dtype, -0.5, 0.5),
        "var": jax.random.uniform(k[5], (mid_channels,), dtype, 0.5, 1.5),
        "eps": 1e-5,
        "w2": jax.random.uniform(k[6], (out_channels, mid_channels, 1), dtype,
                                 minval=-bnd2, maxval=bnd2),
        "b2": jax.random.uniform(k[7], (out_channels,), dtype,
                                 minval=-bnd2, maxval=bnd2),
    }


# Pure-JAX reference (same math, no Pallas) for a sanity check.
def _reference_forward(params, x_nct):
    w1, b1 = params["w1"], params["b1"]
    gamma, beta = params["gamma"], params["beta"]
    mean, var, eps = params["mean"], params["var"], params["eps"]
    w2, b2 = params["w2"], params["b2"]

    x_pad = jnp.pad(x_nct, ((0, 0), (0, 0), (1, 1)), mode="edge")   # replicate
    y = jax.lax.conv_general_dilated(
        x_pad, w1, window_strides=(1,), padding="VALID",
        dimension_numbers=("NCH", "OIH", "NCH")) + b1[None, :, None]
    y = (y - mean[None, :, None]) / jnp.sqrt(var[None, :, None] + eps)
    y = gamma[None, :, None] * y + beta[None, :, None]
    y = jnp.maximum(y, 0.0)
    z = jax.lax.conv_general_dilated(
        y, w2, window_strides=(1,), padding="VALID",
        dimension_numbers=("NCH", "OIH", "NCH")) + b2[None, :, None]
    return z


if __name__ == "__main__":
    key = jax.random.PRNGKey(0)
    k_x, k_p = jax.random.split(key)

    # Small shapes consistent with the module: batch=2, in_channels=4, T=16,
    # out_channels=32 (so mid_channels = 16).
    N, C_in, T = 2, 4, 16
    C_out = 32

    x = jax.random.normal(k_x, (N, C_in, T), dtype=jnp.float32)
    params = init_out_double_conv_params(k_p, C_in, C_out)

    fwd = jax.jit(out_double_conv_forward)
    out = jax.block_until_ready(fwd(params, x))

    ref = _reference_forward(params, x)
    assert out.shape == (N, C_out, T), out.shape
    max_err = float(jnp.max(jnp.abs(out - ref)))
    assert jnp.allclose(out, ref, atol=1e-5, rtol=1e-5), max_err

    print("KERNEL_OK")
</pallas_src>

<mosaic_0001>
module attributes {stable_mosaic.version = 11 : i64} {
  func.func @_out_double_conv_kernel(%arg0: i32, %arg1: i32, %arg2: memref<1x4x128xf32, #tpu.memory_space<vmem>>, %arg3: memref<1x4x128xf32, #tpu.memory_space<vmem>>, %arg4: memref<16x4xf32, #tpu.memory_space<vmem>>, %arg5: memref<16x4xf32, #tpu.memory_space<vmem>>, %arg6: memref<16x4xf32, #tpu.memory_space<vmem>>, %arg7: memref<16x1xf32, #tpu.memory_space<vmem>>, %arg8: memref<32x16xf32, #tpu.memory_space<vmem>>, %arg9: memref<32x1xf32, #tpu.memory_space<vmem>>, %arg10: memref<1x32x128xf32, #tpu.memory_space<vmem>>) attributes {dimension_semantics = [#tpu.dimension_semantics<parallel>, #tpu.dimension_semantics<parallel>], iteration_bounds = array<i64: 2, 1>, scalar_prefetch = 0 : i64, scratch_operands = 0 : i64, tpu.core_type = #tpu.core_type<tc>, window_params = [{transform_indices = @transform_0, window_bounds = array<i64: 1, 4, 128>}, {transform_indices = @transform_1, window_bounds = array<i64: 1, 4, 128>}, {pipeline_mode = #tpu.pipeline_mode<synchronous>, transform_indices = @transform_2, window_bounds = array<i64: 16, 4>}, {pipeline_mode = #tpu.pipeline_mode<synchronous>, transform_indices = @transform_3, window_bounds = array<i64: 16, 4>}, {pipeline_mode = #tpu.pipeline_mode<synchronous>, transform_indices = @transform_4, window_bounds = array<i64: 16, 4>}, {pipeline_mode = #tpu.pipeline_mode<synchronous>, transform_indices = @transform_5, window_bounds = array<i64: 16, 1>}, {pipeline_mode = #tpu.pipeline_mode<synchronous>, transform_indices = @transform_6, window_bounds = array<i64: 32, 16>}, {pipeline_mode = #tpu.pipeline_mode<synchronous>, transform_indices = @transform_7, window_bounds = array<i64: 32, 1>}, {transform_indices = @transform_8, window_bounds = array<i64: 1, 32, 128>}]} {
    %c0 = arith.constant 0 : index
    %c0_0 = arith.constant 0 : index
    %c0_1 = arith.constant 0 : index
    %0 = vector.load %arg2[%c0, %c0_0, %c0_1] : memref<1x4x128xf32, #tpu.memory_space<vmem>>, vector<1x4x128xf32>
    %1 = vector.shape_cast %0 : vector<1x4x128xf32> to vector<4x128xf32>
    %c0_2 = arith.constant 0 : index
    %c0_3 = arith.constant 0 : index
    %c0_4 = arith.constant 0 : index
    %2 = vector.load %arg3[%c0_2, %c0_3, %c0_4] : memref<1x4x128xf32, #tpu.memory_space<vmem>>, vector<1x4x128xf32>
    %3 = vector.shape_cast %2 : vector<1x4x128xf32> to vector<4x128xf32>
    %4 = tpu.concatenate %1, %3 in 1 : vector<4x128xf32>, vector<4x128xf32> -> vector<4x256xf32>
    %5 = vector.extract_strided_slice %4 {offsets = [0, 1], sizes = [4, 128], strides = [1, 1]} : vector<4x256xf32> to vector<4x128xf32>
    %6 = vector.extract_strided_slice %4 {offsets = [0, 2], sizes = [4, 128], strides = [1, 1]} : vector<4x256xf32> to vector<4x128xf32>
    %c0_5 = arith.constant 0 : index
    %c0_6 = arith.constant 0 : index
    %7 = vector.load %arg4[%c0_5, %c0_6] : memref<16x4xf32, #tpu.memory_space<vmem>>, vector<16x4xf32>
    %cst = arith.constant dense<0.000000e+00> : vector<16x128xf32>
    %8 = tpu.matmul %7, %1, %cst {dimension_numbers = #tpu.dot_dimension_numbers<[1], [0], [0], [1], [0, 0, 1, 1], [], []>} : vector<16x4xf32>, vector<4x128xf32>, vector<16x128xf32> -> vector<16x128xf32>
    %c0_7 = arith.constant 0 : index
    %c0_8 = arith.constant 0 : index
    %9 = vector.load %arg5[%c0_7, %c0_8] : memref<16x4xf32, #tpu.memory_space<vmem>>, vector<16x4xf32>
    %cst_9 = arith.constant dense<0.000000e+00> : vector<16x128xf32>
    %10 = tpu.matmul %9, %5, %cst_9 {dimension_numbers = #tpu.dot_dimension_numbers<[1], [0], [0], [1], [0, 0, 1, 1], [], []>} : vector<16x4xf32>, vector<4x128xf32>, vector<16x128xf32> -> vector<16x128xf32>
    %11 = arith.addf %8, %10 : vector<16x128xf32>
    %c0_10 = arith.constant 0 : index
    %c0_11 = arith.constant 0 : index
    %12 = vector.load %arg6[%c0_10, %c0_11] : memref<16x4xf32, #tpu.memory_space<vmem>>, vector<16x4xf32>
    %cst_12 = arith.constant dense<0.000000e+00> : vector<16x128xf32>
    %13 = tpu.matmul %12, %6, %cst_12 {dimension_numbers = #tpu.dot_dimension_numbers<[1], [0], [0], [1], [0, 0, 1, 1], [], []>} : vector<16x4xf32>, vector<4x128xf32>, vector<16x128xf32> -> vector<16x128xf32>
    %14 = arith.addf %11, %13 : vector<16x128xf32>
    %c0_13 = arith.constant 0 : index
    %c0_14 = arith.constant 0 : index
    %15 = vector.load %arg7[%c0_13, %c0_14] : memref<16x1xf32, #tpu.memory_space<vmem>>, vector<16x1xf32>
    %16 = vector.broadcast %15 : vector<16x1xf32> to vector<16x128xf32>
    %17 = arith.addf %14, %16 : vector<16x128xf32>
    %cst_15 = arith.constant 0.000000e+00 : f32
    %18 = vector.broadcast %cst_15 : f32 to vector<16x128xf32>
    %19 = arith.maximumf %17, %18 : vector<16x128xf32>
    %c0_16 = arith.constant 0 : index
    %c0_17 = arith.constant 0 : index
    %20 = vector.load %arg8[%c0_16, %c0_17] : memref<32x16xf32, #tpu.memory_space<vmem>>, vector<32x16xf32>
    %cst_18 = arith.constant dense<0.000000e+00> : vector<32x128xf32>
    %21 = tpu.matmul %20, %19, %cst_18 {dimension_numbers = #tpu.dot_dimension_numbers<[1], [0], [0], [1], [0, 0, 1, 1], [], []>} : vector<32x16xf32>, vector<16x128xf32>, vector<32x128xf32> -> vector<32x128xf32>
    %c0_19 = arith.constant 0 : index
    %c0_20 = arith.constant 0 : index
    %22 = vector.load %arg9[%c0_19, %c0_20] : memref<32x1xf32, #tpu.memory_space<vmem>>, vector<32x1xf32>
    %23 = vector.broadcast %22 : vector<32x1xf32> to vector<32x128xf32>
    %24 = arith.addf %21, %23 : vector<32x128xf32>
    %c0_21 = arith.constant 0 : index
    %c0_22 = arith.constant 0 : index
    %c0_23 = arith.constant 0 : index
    %25 = vector.load %arg10[%c0_21, %c0_22, %c0_23] : memref<1x32x128xf32, #tpu.memory_space<vmem>>, vector<1x32x128xf32>
    %26 = vector.shape_cast %25 : vector<1x32x128xf32> to vector<32x128xf32>
    %27 = vector.shape_cast %24 : vector<32x128xf32> to vector<1x32x128xf32>
    tpu.vector_store %arg10[%c0_21, %c0_22, %c0_23], %27 {strides = array<i32>} : memref<1x32x128xf32, #tpu.memory_space<vmem>>, vector<1x32x128xf32>,
    return
  }
  func.func @transform_0(%arg0: i32, %arg1: i32) -> (i32, i32, i32) {
    %c0_i32 = arith.constant 0 : i32
    %c0_i32_0 = arith.constant 0 : i32
    return %arg0, %c0_i32, %arg1 : i32, i32, i32
  }
  func.func @transform_1(%arg0: i32, %arg1: i32) -> (i32, i32, i32) {
    %c1_i32 = arith.constant 1 : i32
    %0 = arith.addi %arg1, %c1_i32 : i32
    %c1_i32_0 = arith.constant 1 : i32
    %1 = arith.muli %0, %c1_i32_0 : i32
    %c0_i32 = arith.constant 0 : i32
    %c0_i32_1 = arith.constant 0 : i32
    return %arg0, %c0_i32, %1 : i32, i32, i32
  }
  func.func @transform_2(%arg0: i32, %arg1: i32) -> (i32, i32) {
    %c0_i32 = arith.constant 0 : i32
    %c0_i32_0 = arith.constant 0 : i32
    %c0_i32_1 = arith.constant 0 : i32
    return %c0_i32, %c0_i32_0 : i32, i32
  }
  func.func @transform_3(%arg0: i32, %arg1: i32) -> (i32, i32) {
    %c0_i32 = arith.constant 0 : i32
    %c0_i32_0 = arith.constant 0 : i32
    %c0_i32_1 = arith.constant 0 : i32
    return %c0_i32, %c0_i32_0 : i32, i32
  }
  func.func @transform_4(%arg0: i32, %arg1: i32) -> (i32, i32) {
    %c0_i32 = arith.constant 0 : i32
    %c0_i32_0 = arith.constant 0 : i32
    %c0_i32_1 = arith.constant 0 : i32
    return %c0_i32, %c0_i32_0 : i32, i32
  }
  func.func @transform_5(%arg0: i32, %arg1: i32) -> (i32, i32) {
    %c0_i32 = arith.constant 0 : i32
    %c0_i32_0 = arith.constant 0 : i32
    %c0_i32_1 = arith.constant 0 : i32
    return %c0_i32, %c0_i32_0 : i32, i32
  }
  func.func @transform_6(%arg0: i32, %arg1: i32) -> (i32, i32) {
    %c0_i32 = arith.constant 0 : i32
    %c0_i32_0 = arith.constant 0 : i32
    %c0_i32_1 = arith.constant 0 : i32
    return %c0_i32, %c0_i32_0 : i32, i32
  }
  func.func @transform_7(%arg0: i32, %arg1: i32) -> (i32, i32) {
    %c0_i32 = arith.constant 0 : i32
    %c0_i32_0 = arith.constant 0 : i32
    %c0_i32_1 = arith.constant 0 : i32
    return %c0_i32, %c0_i32_0 : i32, i32
  }
  func.func @transform_8(%arg0: i32, %arg1: i32) -> (i32, i32, i32) {
    %c0_i32 = arith.constant 0 : i32
    %c0_i32_0 = arith.constant 0 : i32
    return %arg0, %c0_i32, %arg1 : i32, i32, i32
  }
}

</mosaic_0001>

<bundles_post_ra>
// kernel: out_double_conv_forward.1
= control target key start
LH: loop header
LB: loop body
LE: loop exit
PB: predicated region body
PF: predicated region fallthrough
CT: control target
= control target key end

     0   :  { %s1077_s27 = smov 0   ;;  %s1079_s28 = smov 0   ;;  %s1181_s0 = inlined_call_operand.vmem [shape: f32[2,4,256], index: 0, kind: input, shape index: {}, may-alias: {0,1}]   ;;  %s1182_s1 = inlined_call_operand.vmem [shape: f32[2,4,256], index: 1, kind: input, shape index: {}, may-alias: {0,1}]   ;;  %s1183_s2 = inlined_call_operand.vmem [shape: f32[16,4], index: 2, kind: input, shape index: {}]   ;;  %s1184_s3 = inlined_call_operand.vmem [shape: f32[16,4], index: 3, kind: input, shape index: {}]   ;;  %s1185_s4 = inlined_call_operand.vmem [shape: f32[16,4], index: 4, kind: input, shape index: {}]   ;;  %s1186_s5 = inlined_call_operand.vmem [shape: f32[16,1], index: 5, kind: input, shape index: {}]   ;;  %s1187_s6 = inlined_call_operand.vmem [shape: f32[32,16], index: 6, kind: input, shape index: {}]   ;;  %s1188_s7 = inlined_call_operand.vmem [shape: f32[32,1], index: 7, kind: input, shape index: {}]   ;;  %s1189_s8 = inlined_call_operand.vmem [shape: f32[2,32,128], index: 8, kind: output, shape index: {}]  }
   0x1   :  { %s1081_s29 = smov 0  }
   0x2 LB: > { %s30_s30 = sadd.s32 1, %s1023_s28  ;;  %p901_p0 = scmp.ge.s32.totalorder %s1027_s29, 1  ;;  %s1027_s29 = sphi %s1081_s29, %s18_s29   ;;  %s1023_s28 = sphi %s1079_s28, %s1191_s28   ;;  %s1019_s27 = sphi %s1077_s27, %s1190_s27  }
   0x3   : > { %p32_p1 = scmp.ge.s32.totalorder %s30_s30, 2  ;;  %p300_p2 = scmp.lt.s32.totalorder %s1027_s29, 3 }
   0x5   : > { %s1193_s30 = smov (%p32_p1, %s30_s30), 0  ;;  %p301_p3 = pnand %p901_p0, %p300_p2 }
   0x6   : > { %p349_p4 = scmp.lt.s32.totalorder (!%p301_p3), %s1019_s27, 1  ;;  %v379_v0 = vld [vmem:[%s1184_s3] sm:$0xff] (!%p301_p3)  ;;  %vm389_vm0 = vcmask (!%p301_p3), 31744   ;;  %s1029_s19 = smov (!%p301_p3), 127   ;;  %v651_v3 = vld [vmem:[%s1186_s5 + $0x8] sm:$0xff] (!%p301_p3)  ;;  %v1031_v5 = vmov (!%p301_p3), 0  }
   0x7   : > { %304 = sbr.rel (%p301_p3) target bundleno = 599 (0x257), region = 52  ;;  %945 = vmatprep.mubr.msk.f32.mxu0 (!%p301_p3), %vm389_vm0, %v379_v0  ;;  %s1030_s20 = smov (!%p301_p3), 126   ;;  %v650_v4 = vld [vmem:[%s1186_s5] sm:$0xff] (!%p301_p3)  ;;  %1004 = vset.pattern.permute.xlu1 (!%p301_p3), %v1031_v5  ;;  %v671_v7 = vld [vmem:[%s1188_s7 + $0x8] sm:$0xff] (!%p301_p3)  ;;  %v672_v8 = vld [vmem:[%s1188_s7 + $0x10] sm:$0xff] (!%p301_p3)  ;;  %vm387_vm1 = vcmask (!%p301_p3), 1039360  }
   0x8   : > { %1003 = vset.pattern.permute.xlu0 (!%p301_p3), %v1031_v5  ;;  %v670_v6 = vld [vmem:[%s1188_s7] sm:$0xff] (!%p301_p3)  ;;  %v673_v9 = vld [vmem:[%s1188_s7 + $0x18] sm:$0xff] (!%p301_p3)  ;;  %vm396_vm2 = vcmask (!%p301_p3), 1043456   ;;  %vm563_vm3 = vcmask (!%p301_p3), 1031168   ;;  %v380_v15 = vld [vmem:[%s1184_s3 + $0x8] sm:$0xff] (!%p301_p3)  ;;  %vm694_vm4 = vcmask (!%p301_p3), 130048  }
   0x9   : > { %v377_v16 = vld [vmem:[%s1183_s2] sm:$0xff] (!%p301_p3)  ;;  %v378_v18 = vld [vmem:[%s1183_s2 + $0x8] sm:$0xff] (!%p301_p3)  ;;  %v668_v32 = vld [vmem:[%s1187_s6 + $0x10] sm:$0xff] (!%p301_p3) }
   0xa   : > { %v557_v19 = vld [vmem:[%s1185_s4] sm:$0xff] (!%p301_p3)  ;;  %v558_v20 = vld [vmem:[%s1185_s4 + $0x8] sm:$0xff] (!%p301_p3)  ;;  %v669_v33 = vld [vmem:[%s1187_s6 + $0x18] sm:$0xff] (!%p301_p3) }
   0xb   : > { %v666_v21 = vld [vmem:[%s1187_s6] sm:$0xff] (!%p301_p3)  ;;  %v667_v31 = vld [vmem:[%s1187_s6 + $0x8] sm:$0xff] (!%p301_p3) }
   0xc   : > { %962 = vmatprep.mubr.msk.f32.mxu1 (!%p301_p3), %vm694_vm4, %v666_v21 }
   0xe   : > { %s1195_s27 = smov (!%p349_p4, %s1019_s27), 1 }
   0xf   : > { %s923_s11 = sshll.u32 %s1195_s27, 3 }
  0x10   : > { %s356_s14 = scalar_lea.vmem %s1181_s0, %s923_s11  ;;  %s925_s15 = sadd.s32 4, %s923_s11 }
  0x11   : > { %v375_v1 = vld [vmem:[%s356_s14] sm:$0xf]  ;;  %s365_s18 = scalar_lea.vmem %s1182_s1, %s925_s15  ;;  %s926_s15 = sshll.u32 %s1195_s27, 5 }
  0x12   : > { %383 = vrot.lane.b32.xlu0 %v375_v1, %s1029_s19  ;;  %559 = vrot.lane.b32.xlu1 %v375_v1, %s1030_s20  ;;  %v376_v2 = vld [vmem:[%s365_s18] sm:$0xf]  ;;  %s374_s18 = scalar_lea.vmem %s1189_s8, %s926_s15 }
  0x16   : > { %385 = vrot.lane.b32.xlu0 %v376_v2, %s1029_s19  ;;  %561 = vrot.lane.b32.xlu1 %v376_v2, %s1030_s20 }
  0x1a   : > { %659 = vperm.xlu1 %1004, %v651_v3   ;;  %654 = vperm.xlu0 %1003, %v650_v4  }
  0x1e   : > { %676 = vperm.xlu1 %1004, %v670_v6   ;;  %681 = vperm.xlu0 %1003, %v671_v7  }
  0x22   : > { %686 = vperm.xlu1 %1004, %v672_v8   ;;  %691 = vperm.xlu0 %1003, %v673_v9  }
  0x84   : > { %v384_v10 = vpop.permute.xlu0 %383  ;;  %v560_v11 = vpop.permute.xlu1 %559 }
  0x88   : > { %v386_v12 = vpop.permute.xlu0 %385  ;;  %v562_v13 = vpop.permute.xlu1 %561 }
  0x89   : > { %v388_v14 = vsel %vm387_vm1, %v384_v10, %v386_v12  ;;  %v564_v17 = vsel %vm563_vm3, %v560_v11, %v562_v13 }
  0x8a   : > { %943 = vmatprep.subr.msk.mxu0 %vm396_vm2, %v388_v14 }
  0x8b   : > { %944 = vmatpush3.msk.msra.mxu0 %vm396_vm2, %v388_v14 }
  0x8c   : > { %946 = vmatmul.mubr.msk.f32.vlgmr.msra.gmra.mrb[0].mxu0 %vm389_vm0, %v380_v15  ;;  %948 = vmatprep.subr.msk.mxu0 %vm396_vm2, %v375_v1 }
  0x8d   : > { %949 = vmatpush3.msk.msra.mxu0 %vm396_vm2, %v375_v1  ;;  %950 = vmatprep.mubr.msk.f32.mxu0 %vm389_vm0, %v377_v16 }
  0x8e   : > { %953 = vmatprep.subr.msk.mxu0 %vm396_vm2, %v564_v17 }
  0x94   : > { %951 = vmatmul.mubr.msk.f32.vlgmr.msra.gmra.mrb[0].mxu0 %vm389_vm0, %v378_v18 }
  0x95   : > { %954 = vmatpush3.msk.msra.mxu0 %vm396_vm2, %v564_v17  ;;  %955 = vmatprep.mubr.msk.f32.mxu0 %vm389_vm0, %v557_v19 }
  0x99   : > { %v660_v22 = vpop.permute.xlu1 %659  ;;  %v655_v24 = vpop.permute.xlu0 %654 }
  0x9c   : > { %956 = vmatmul.mubr.msk.f32.vlgmr.msra.gmra.mrb[0].mxu0 %vm389_vm0, %v558_v20 }
  0x9d   : > { %v682_v34 = vpop.permute.xlu0 %681  ;;  %v677_v35 = vpop.permute.xlu1 %676 }
  0xa1   : > { %v692_v40 = vpop.permute.xlu0 %691  ;;  %v687_v42 = vpop.permute.xlu1 %686 }
 0x16f   : > { %v957_v23 = vpop.f32.mrb[0].mxu0 }
 0x170   : > { %v663_v25 = vadd.f32 %v957_v23, %v660_v22  ;;  %v639_v26 = vpop.f32.mrb[1].mxu0 }
 0x171   : > { %v662_v27 = vadd.f32 %v655_v24, %v639_v26 }
 0x172   : > { %v665_v28 = vmax.f32 %v663_v25, 0.0 }
 0x173   : > { %v664_v29 = vmax.f32 %v662_v27, 0.0 }
 0x175   : > { %v968_v30 = vpack.c.bf16 %v665_v28, %v664_v29 }
 0x177   : > { %969 = vmatprep.subr.bf16.mxu1 %v968_v30 }
 0x178   : > { %971 = vmatpush3.bf16.msra.mxu1 %v968_v30 }
 0x17b   : > { %963 = vmatmul.mubr.msk.f32.vlgmr.msra.gmra.mrb[0].mxu1 %vm694_vm4, %v667_v31 }
 0x17c   : > { %965 = vmatprep.mubr.msk.f32.mxu1 %vm694_vm4, %v668_v32 }
 0x17f   : > { %966 = vmatmul.mubr.msk.f32.gmra.mrb[2].mxu1 %vm694_vm4, %v669_v33 }
 0x24e   : > { %v964_v36 = vpop.f32.mrb[0].mxu1 }
 0x24f   : > { %v779_v37 = vadd.f32 %v964_v36, %v682_v34  ;;  %v773_v38 = vpop.f32.mrb[1].mxu1 }
 0x250   : > { %v774_v39 = vadd.f32 %v773_v38, %v677_v35 }
 0x251   : > { %793 = vst [vmem:[%s374_s18 + $0x8] sm:$0xff] %v779_v37 }
 0x252   : > { %792 = vst [vmem:[%s374_s18] sm:$0xff] %v774_v39  ;;  %v967_v41 = vpop.f32.mrb[2].mxu1 }
 0x253   : > { %v789_v43 = vadd.f32 %v967_v41, %v692_v40  ;;  %v783_v44 = vpop.f32.mrb[3].mxu1 }
 0x254   : > { %v784_v45 = vadd.f32 %v783_v44, %v687_v42 }
 0x255   : > { %795 = vst [vmem:[%s374_s18 + $0x18] sm:$0xff] %v789_v43 }
 0x256   : > { %794 = vst [vmem:[%s374_s18 + $0x10] sm:$0xff] %v784_v45 }
 0x257 PF: > { %s18_s29 = sadd.s32 1, %s1027_s29   ;;  %s1190_s27 = smov %s1023_s28 }
 0x258   : > { %p15_p5 = scmp.ge.s32.totalorder %s18_s29, 4   ;;  %s1191_s28 = smov %s1193_s30 }
 0x25a   :  { %17 = sbr.rel (!%p15_p5) target bundleno = 2 (0x2), region = 85 }

</bundles_post_ra>
